<compile_context>
chip_gen: v5e
topology: v5e:2x2
jax: 0.10.0
libtpu: 0.0.40
codegen_flags: <defaults>
</compile_context>

<pallas_src>
import jax
import jax.numpy as jnp
from jax.experimental import pallas as pl
from jax.experimental.pallas import tpu as pltpu

# Problem sizes (small, consistent with a segmentation forward pass).
B, C_IN, H, W = 2, 4, 16, 16
C_HID = 32
C_OUT = 1          # binary segmentation logits
KH = KW = 3
PAD = 1

K_RAW = KH * KW * C_IN          # 36 conv taps*channels
K_BIAS = K_RAW                  # row 36 = constant 1.0 (carries b1)
K_PAD = 48                      # 37 -> 48: minimum legal bf16 sublane pad (16)
M = B * H * W                   # 512 -> lane dimension (multiple of 128)


def _seg_kernel(p_ref, w1_ref, w2_ref, b2_ref, o_ref):
    """Single grid step; everything lane-dense along the spatial dim.

    p_ref : (K_PAD, M)    bf16  im2col patch matrix (row 36 = 1.0 bias row)
    w1_ref: (C_HID, K_PAD) bf16 packed 3x3 conv weights (col 36 = b1)
    w2_ref: (C_HID, 1)    f32   1x1 conv weights, kept f32 for the VPU reduce
    b2_ref: (1, 1)        f32   SMEM scalar
    o_ref : (C_OUT, M)    f32   lane-dense logits slab
    """
    # --- Conv2d(C_IN, C_HID, k=3, pad=1) + b1: one MXU push, K=48 ---------
    h = jnp.dot(w1_ref[...], p_ref[...],
                preferred_element_type=jnp.float32)        # (C_HID, M) f32
    h = jnp.maximum(h, 0.0)                                 # ReLU in f32

    # --- Conv2d(C_HID, 1, k=1): f32 weighted sublane reduction (VPU/XLU) ---
    z = jnp.sum(w2_ref[...] * h, axis=0, keepdims=True) + b2_ref[0, 0]

    o_ref[...] = z.astype(o_ref.dtype)


def pack_params(w1, b1, w2, b2):
    """One-time weight layout prep (model is frozen => run once, not per call)."""
    # (KH, KW, C_IN, C_HID) -> (K_RAW, C_HID); row order (dy, dx, c) matches
    # the patch flatten order below.
    w1_flat = w1.reshape(K_RAW, C_HID)
    w1_flat = jnp.concatenate([w1_flat, b1.reshape(1, C_HID)], axis=0)  # bias row 36
    w1_flat = jnp.pad(w1_flat, ((0, K_PAD - K_RAW - 1), (0, 0)))        # (48, C_HID)
    w1_p = w1_flat.T.astype(jnp.bfloat16)                               # (C_HID, 48)

    w2_col = w2.reshape(C_HID, C_OUT).astype(jnp.float32)               # (C_HID, 1) f32
    b2_s = b2.reshape(1, 1).astype(jnp.float32)                         # (1, 1) SMEM
    return w1_p, w2_col, b2_s


@jax.jit
def segmentation_forward(x_nchw, w1_p, w2_col, b2_s):
    """forward(batch): z = self.model(batch).

    x_nchw: (B, C_IN, H, W) float32  ->  returns (B, C_OUT, H, W) float32 logits.
    """
    # ---- im2col + bias row (activation-only glue; fuses under jit) --------
    x_nhwc = jnp.transpose(x_nchw, (0, 2, 3, 1))                     # (B, H, W, C_IN)
    x_pad = jnp.pad(x_nhwc, ((0, 0), (PAD, PAD), (PAD, PAD), (0, 0)))

    cols = [x_pad[:, dy:dy + H, dx:dx + W, :]
            for dy in range(KH) for dx in range(KW)]                 # 9 x (B,H,W,C_IN)
    cols.append(jnp.ones((B, H, W, 1), x_nchw.dtype))                # bias row -> folds b1
    patches = jnp.concatenate(cols, axis=-1).reshape(M, K_RAW + 1)   # (M, 37)
    patches = jnp.pad(patches, ((0, 0), (0, K_PAD - K_RAW - 1)))     # (M, 48)
    patches_t = patches.T.astype(jnp.bfloat16)                       # (48, M)

    out = pl.pallas_call(
        _seg_kernel,
        out_shape=jax.ShapeDtypeStruct((C_OUT, M), jnp.float32),
        grid_spec=pltpu.PrefetchScalarGridSpec(
            num_scalar_prefetch=0,
            grid=(1,),                      # single step: M=512 fits one block;
                                            # no per-step overhead at this size.
            in_specs=[
                pl.BlockSpec((K_PAD, M), lambda i: (0, 0)),
                pl.BlockSpec((C_HID, K_PAD), lambda i: (0, 0)),
                pl.BlockSpec((C_HID, C_OUT), lambda i: (0, 0)),
                pl.BlockSpec(memory_space=pltpu.MemorySpace.SMEM),   # b2 scalar
            ],
            out_specs=pl.BlockSpec((C_OUT, M), lambda i: (0, 0)),
        ),
        compiler_params=pltpu.CompilerParams(
            dimension_semantics=("arbitrary",)),
    )(patches_t, w1_p, w2_col, b2_s)

    # (C_OUT=1, B*H*W) -> (B, C_OUT, H, W) to match PyTorch output convention.
    return out.reshape(B, H, W)[:, None, :, :]


def _init_params(key):
    """Deterministic parameter init (frozen model => weights fixed anyway)."""
    k1, k2, k3, k4 = jax.random.split(key, 4)
    w1 = jax.random.normal(k1, (KH, KW, C_IN, C_HID), jnp.float32) * 0.1
    b1 = jax.random.normal(k2, (C_HID,), jnp.float32) * 0.01
    w2 = jax.random.normal(k3, (C_HID, C_OUT), jnp.float32) * 0.1
    b2 = jax.random.normal(k4, (C_OUT,), jnp.float32) * 0.01
    return w1, b1, w2, b2


def _reference(x_nchw, w1, b1, w2, b2):
    """Pure-JAX reference (lax conv, f32) for a sanity check."""
    x_nhwc = jnp.transpose(x_nchw, (0, 2, 3, 1))
    h = jax.lax.conv_general_dilated(
        x_nhwc, w1, window_strides=(1, 1), padding="SAME",
        dimension_numbers=("NHWC", "HWIO", "NHWC")) + b1
    h = jnp.maximum(h, 0.0)
    z = jnp.einsum("bhwc,co->bhwo", h, w2) + b2
    return jnp.transpose(z, (0, 3, 1, 2))


if __name__ == "__main__":
    key = jax.random.PRNGKey(0)
    kx, kp = jax.random.split(key)
    x = jax.random.normal(kx, (B, C_IN, H, W), jnp.float32)
    w1, b1, w2, b2 = _init_params(kp)

    # One-time packing (frozen model), then the jitted per-call forward.
    w1_p, w2_col, b2_s = pack_params(w1, b1, w2, b2)

    z = segmentation_forward(x, w1_p, w2_col, b2_s)
    z = jax.block_until_ready(z)

    z_ref = _reference(x, w1, b1, w2, b2)
    assert z.shape == (B, C_OUT, H, W)
    # Layer 1 runs with bf16 MXU operands; layer 2 is pure f32 now.
    assert jnp.allclose(z, z_ref, atol=3e-2, rtol=3e-2)

    print("KERNEL_OK")
</pallas_src>

<mosaic_0001>
module attributes {stable_mosaic.version = 11 : i64} {
  func.func @_seg_kernel(%arg0: i32, %arg1: memref<48x512xbf16, #tpu.memory_space<vmem>>, %arg2: memref<32x48xbf16, #tpu.memory_space<vmem>>, %arg3: memref<32x1xf32, #tpu.memory_space<vmem>>, %arg4: memref<1x1xf32, #tpu.memory_space<smem>>, %arg5: memref<1x512xf32, #tpu.memory_space<vmem>>) attributes {dimension_semantics = [#tpu.dimension_semantics<arbitrary>], iteration_bounds = array<i64: 1>, scalar_prefetch = 0 : i64, scratch_operands = 0 : i64, tpu.core_type = #tpu.core_type<tc>, window_params = [{pipeline_mode = #tpu.pipeline_mode<synchronous>, transform_indices = @transform_0, window_bounds = array<i64: 48, 512>}, {pipeline_mode = #tpu.pipeline_mode<synchronous>, transform_indices = @transform_1, window_bounds = array<i64: 32, 48>}, {pipeline_mode = #tpu.pipeline_mode<synchronous>, transform_indices = @transform_2, window_bounds = array<i64: 32, 1>}, {transform_indices = @transform_3, window_bounds = array<i64: 1, 1>}, {pipeline_mode = #tpu.pipeline_mode<synchronous>, transform_indices = @transform_4, window_bounds = array<i64: 1, 512>}]} {
    %c0 = arith.constant 0 : index
    %c0_0 = arith.constant 0 : index
    %0 = vector.load %arg2[%c0, %c0_0] : memref<32x48xbf16, #tpu.memory_space<vmem>>, vector<32x48xbf16>
    %c0_1 = arith.constant 0 : index
    %c0_2 = arith.constant 0 : index
    %1 = vector.load %arg1[%c0_1, %c0_2] : memref<48x512xbf16, #tpu.memory_space<vmem>>, vector<48x512xbf16>
    %cst = arith.constant dense<0.000000e+00> : vector<32x512xf32>
    %2 = tpu.matmul %0, %1, %cst {dimension_numbers = #tpu.dot_dimension_numbers<[1], [0], [0], [1], [0, 0, 1, 1], [], []>} : vector<32x48xbf16>, vector<48x512xbf16>, vector<32x512xf32> -> vector<32x512xf32>
    %cst_3 = arith.constant 0.000000e+00 : f32
    %3 = vector.broadcast %cst_3 : f32 to vector<32x512xf32>
    %4 = arith.maximumf %2, %3 : vector<32x512xf32>
    %c0_4 = arith.constant 0 : index
    %c0_5 = arith.constant 0 : index
    %5 = vector.load %arg3[%c0_4, %c0_5] : memref<32x1xf32, #tpu.memory_space<vmem>>, vector<32x1xf32>
    %6 = vector.broadcast %5 : vector<32x1xf32> to vector<32x512xf32>
    %7 = arith.mulf %6, %4 : vector<32x512xf32>
    %cst_6 = arith.constant dense<0.000000e+00> : vector<512xf32>
    %8 = vector.multi_reduction <add>, %7, %cst_6 [0] : vector<32x512xf32> to vector<512xf32>
    %9 = vector.shape_cast %8 : vector<512xf32> to vector<1x512xf32>
    %c0_7 = arith.constant 0 : index
    %c0_8 = arith.constant 0 : index
    %10 = memref.load %arg4[%c0_7, %c0_8] : memref<1x1xf32, #tpu.memory_space<smem>>
    %11 = vector.broadcast %10 : f32 to vector<1x512xf32>
    %12 = arith.addf %9, %11 : vector<1x512xf32>
    %c0_9 = arith.constant 0 : index
    %c0_10 = arith.constant 0 : index
    %13 = vector.load %arg5[%c0_9, %c0_10] : memref<1x512xf32, #tpu.memory_space<vmem>>, vector<1x512xf32>
    tpu.vector_store %arg5[%c0_9, %c0_10], %12 {strides = array<i32>} : memref<1x512xf32, #tpu.memory_space<vmem>>, vector<1x512xf32>,
    return
  }
  func.func @transform_0(%arg0: i32) -> (i32, i32) {
    %c0_i32 = arith.constant 0 : i32
    %c0_i32_0 = arith.constant 0 : i32
    %c0_i32_1 = arith.constant 0 : i32
    return %c0_i32, %c0_i32_0 : i32, i32
  }
  func.func @transform_1(%arg0: i32) -> (i32, i32) {
    %c0_i32 = arith.constant 0 : i32
    %c0_i32_0 = arith.constant 0 : i32
    %c0_i32_1 = arith.constant 0 : i32
    return %c0_i32, %c0_i32_0 : i32, i32
  }
  func.func @transform_2(%arg0: i32) -> (i32, i32) {
    %c0_i32 = arith.constant 0 : i32
    %c0_i32_0 = arith.constant 0 : i32
    %c0_i32_1 = arith.constant 0 : i32
    return %c0_i32, %c0_i32_0 : i32, i32
  }
  func.func @transform_3(%arg0: i32) -> (i32, i32) {
    %c0_i32 = arith.constant 0 : i32
    %c0_i32_0 = arith.constant 0 : i32
    %c0_i32_1 = arith.constant 0 : i32
    return %c0_i32, %c0_i32_0 : i32, i32
  }
  func.func @transform_4(%arg0: i32) -> (i32, i32) {
    %c0_i32 = arith.constant 0 : i32
    %c0_i32_0 = arith.constant 0 : i32
    %c0_i32_1 = arith.constant 0 : i32
    return %c0_i32, %c0_i32_0 : i32, i32
  }
}

</mosaic_0001>

<bundles_post_ra>
// kernel: segmentation_forward.1
= control target key start
LH: loop header
LB: loop body
LE: loop exit
PB: predicated region body
PF: predicated region fallthrough
CT: control target
= control target key end

     0   :  { %v390_v3 = vmov 0   ;;  %vm105_vm0 = vcmask 392192   ;;  %vm293_vm1 = vcmask 1040384   ;;  %vm295_vm2 = vcmask 1042434   ;;  %s520_s0 = inlined_call_operand.vmem [shape: bf16[48,512], index: 0, kind: input, shape index: {}]   ;;  %s521_s2 = inlined_call_operand.vmem [shape: f32[32,1], index: 2, kind: input, shape index: {}]   ;;  %s522_s1 = inlined_call_operand.vmem [shape: bf16[32,48], index: 1, kind: input, shape index: {}]   ;;  %s523_s3 = inlined_call_operand.<no memory space> [shape: f32[1,1], index: 3, kind: input, shape index: {}]   ;;  %s524_s4 = inlined_call_operand.vmem [shape: f32[1,512], index: 4, kind: output, shape index: {}]  }
   0x1   :  { %v351_v0 = vld [vmem:[%s520_s0 + $0x40] sm:$0xf]  ;;  %v385_v1 = vld [vmem:[%s520_s0 + $0x4c] sm:$0xf0]  ;;  %v383_v2 = vld [vmem:[%s520_s0 + $0x44] sm:$0xf]  ;;  %388 = vset.pattern.permute.xlu0 %v390_v3  ;;  %389 = vset.pattern.permute.xlu1 %v390_v3 }
   0x2   :  { %v352_v4 = vor.u32 %v385_v1, %v351_v0  ;;  %v353_v5 = vld [vmem:[%s520_s0 + $0x50] sm:$0xf0]  ;;  %v359_v6 = vld [vmem:[%s520_s0 + $0x48] sm:$0xf]  ;;  %v386_v7 = vld [vmem:[%s520_s0 + $0x54] sm:$0xf0] }
   0x3   :  { %v356_v8 = vor.u32 %v383_v2, %v353_v5  ;;  %v360_v9 = vor.u32 %v386_v7, %v359_v6  ;;  %v384_v10 = vld [vmem:[%s520_s0 + $0x4c] sm:$0xf]  ;;  %v361_v11 = vld [vmem:[%s520_s0 + $0x58] sm:$0xf0]  ;;  %v335_v12 = vld [vmem:[%s520_s0 + $0x20] sm:$0xf] }
   0x4   :  { %117 = vmatpush.bf16.msra.mxu0 %v352_v4  ;;  %v364_v13 = vor.u32 %v384_v10, %v361_v11  ;;  %v381_v14 = vld [vmem:[%s520_s0 + $0x2c] sm:$0xf0]  ;;  %v379_v15 = vld [vmem:[%s520_s0 + $0x24] sm:$0xf]  ;;  %v337_v16 = vld [vmem:[%s520_s0 + $0x30] sm:$0xf0] }
   0x5   :  { %136 = vmatpush.bf16.msra.mxu1 %v356_v8  ;;  %155 = vmatpush.bf16.msra.mxu2 %v360_v9  ;;  %v336_v17 = vor.u32 %v381_v14, %v335_v12  ;;  %v340_v18 = vor.u32 %v379_v15, %v337_v16  ;;  %v343_v19 = vld [vmem:[%s520_s0 + $0x28] sm:$0xf]  ;;  %v382_v20 = vld [vmem:[%s520_s0 + $0x34] sm:$0xf0]  ;;  %v380_v21 = vld [vmem:[%s520_s0 + $0x2c] sm:$0xf] }
   0x6   :  { %174 = vmatpush.bf16.msra.mxu3 %v364_v13  ;;  %v344_v22 = vor.u32 %v382_v20, %v343_v19  ;;  %v345_v23 = vld [vmem:[%s520_s0 + $0x38] sm:$0xf0]  ;;  %v319_v24 = vld [vmem:[%s520_s0] sm:$0xf]  ;;  %v377_v25 = vld [vmem:[%s520_s0 + $0xc] sm:$0xf0] }
   0x7   :  { %v348_v26 = vor.u32 %v380_v21, %v345_v23  ;;  %v375_v27 = vld [vmem:[%s520_s0 + $0x4] sm:$0xf]  ;;  %v321_v28 = vld [vmem:[%s520_s0 + $0x10] sm:$0xf0]  ;;  %v327_v29 = vld [vmem:[%s520_s0 + $0x8] sm:$0xf]  ;;  %v320_v30 = vor.u32 %v377_v25, %v319_v24 }
   0x8   :  { %118 = vmatpush.bf16.msra.mxu0 %v336_v17  ;;  %v378_v31 = vld [vmem:[%s520_s0 + $0x14] sm:$0xf0]  ;;  %v376_v32 = vld [vmem:[%s520_s0 + $0xc] sm:$0xf]  ;;  %v329_v33 = vld [vmem:[%s520_s0 + $0x18] sm:$0xf0]  ;;  %v324_v34 = vor.u32 %v375_v27, %v321_v28 }
   0x9   :  { %137 = vmatpush.bf16.msra.mxu1 %v340_v18  ;;  %156 = vmatpush.bf16.msra.mxu2 %v344_v22  ;;  %v328_v35 = vor.u32 %v378_v31, %v327_v29  ;;  %v204_v36 = vld [vmem:[%s521_s2] sm:$0xff]  ;;  %v332_v37 = vor.u32 %v376_v32, %v329_v33  ;;  %v206_v38 = vld [vmem:[%s521_s2 + $0x10] sm:$0xff]  ;;  %v205_v40 = vld [vmem:[%s521_s2 + $0x8] sm:$0xff]  ;;  %vm297_vm3 = vcmask 1041408  }
   0xa   :  { %175 = vmatpush.bf16.msra.mxu3 %v348_v26  ;;  %210 = vperm.xlu0 %388, %v204_v36   ;;  %v373_v39 = vld [vmem:[%s522_s1] sm:$0xff]  ;;  %v207_v41 = vld [vmem:[%s521_s2 + $0x18] sm:$0xff]  ;;  %v374_v42 = vld [vmem:[%s522_s1 + $0x8] sm:$0xff] }
   0xb   :  { %220 = vperm.xlu1 %389, %v206_v38  }
   0xc   :  { %119 = vmatpush.bf16.msra.mxu0 %v320_v30 }
   0xd   :  { %138 = vmatpush.bf16.msra.mxu1 %v324_v34  ;;  %157 = vmatpush.bf16.msra.mxu2 %v328_v35 }
   0xe   :  { %176 = vmatpush.bf16.msra.mxu3 %v332_v37 }
   0xf   :  { %365 = vmatmul.msk.bf16.vlgmr.msra.gmra.mxu0 %vm105_vm0, %v373_v39 }
  0x10   :  { %367 = vmatmul.msk.bf16.vlgmr.msra.gmra.mxu1 %vm105_vm0, %v373_v39  ;;  %369 = vmatmul.msk.bf16.vlgmr.msra.gmra.mxu2 %vm105_vm0, %v373_v39 }
  0x11   :  { %371 = vmatmul.msk.bf16.vlgmr.msra.gmra.mxu3 %vm105_vm0, %v373_v39 }
  0x12   :  { %215 = vperm.xlu0 %388, %v205_v40  }
  0x13   :  { %225 = vperm.xlu1 %389, %v207_v41  }
  0x1f   :  { %366 = vmatmul.msk.bf16.gmra.mxu0 %vm105_vm0, %v374_v42 }
  0x20   :  { %368 = vmatmul.msk.bf16.gmra.mxu1 %vm105_vm0, %v374_v42  ;;  %370 = vmatmul.msk.bf16.gmra.mxu2 %vm105_vm0, %v374_v42 }
  0x21   :  { %372 = vmatmul.msk.bf16.gmra.mxu3 %vm105_vm0, %v374_v42 }
  0x7c   :  { %v211_v45 = vpop.permute.xlu0 %210 }
  0x7d   :  { %v221_v51 = vpop.permute.xlu1 %220 }
  0x84   :  { %v216_v58 = vpop.permute.xlu0 %215 }
  0x85   :  { %v226_v15 = vpop.permute.xlu1 %225 }
  0x8c   :  { %v121_v43 = vpop.f32.mrf.mxu0 }
  0x8d   :  { %v140_v44 = vpop.f32.mrf.mxu1  ;;  %v188_v54 = vmax.f32 %v121_v43, 0.0 }
  0x8e   :  { %v189_v60 = vmax.f32 %v140_v44, 0.0 }
  0x8f   :  { %v228_v62 = vmul.f32 %v211_v45, %v188_v54 }
  0x90   :  { %v229_v3 = vmul.f32 %v211_v45, %v189_v60 }
  0x93   :  { %v159_v46 = vpop.f32.mrf.mxu2 }
  0x94   :  { %v178_v47 = vpop.f32.mrf.mxu3  ;;  %v123_v48 = vpop.f32.mrf.mxu0  ;;  %v190_v12 = vmax.f32 %v159_v46, 0.0 }
  0x95   :  { %v142_v49 = vpop.f32.mrf.mxu1  ;;  %v192_v55 = vmax.f32 %v123_v48, 0.0  ;;  %v191_v17 = vmax.f32 %v178_v47, 0.0 }
  0x96   :  { %v193_v57 = vmax.f32 %v142_v49, 0.0  ;;  %v230_v26 = vmul.f32 %v211_v45, %v190_v12 }
  0x97   :  { %v232_v63 = vmul.f32 %v216_v58, %v192_v55  ;;  %v231_v29 = vmul.f32 %v211_v45, %v191_v17 }
  0x98   :  { %v233_v0 = vmul.f32 %v216_v58, %v193_v57 }
  0x99   :  { %v244_v8 = vadd.f32 %v232_v63, %v228_v62 }
  0x9a   :  { %v253_v13 = vadd.f32 %v233_v0, %v229_v3 }
  0x9b   :  { %v161_v50 = vpop.f32.mrf.mxu2 }
  0x9c   :  { %v180_v52 = vpop.f32.mrf.mxu3  ;;  %v126_v53 = vpop.f32.mrf.mxu0  ;;  %v194_v4 = vmax.f32 %v161_v50, 0.0 }
  0x9d   :  { %v145_v56 = vpop.f32.mrf.mxu1  ;;  %v196_v59 = vmax.f32 %v126_v53, 0.0  ;;  %v195_v9 = vmax.f32 %v180_v52, 0.0 }
  0x9e   :  { %v197_v61 = vmax.f32 %v145_v56, 0.0  ;;  %v234_v21 = vmul.f32 %v216_v58, %v194_v4 }
  0x9f   :  { %v236_v1 = vmul.f32 %v221_v51, %v196_v59  ;;  %v235_v24 = vmul.f32 %v216_v58, %v195_v9  ;;  %v281_v59 = vstv %s523_s3 }
  0xa0   :  { %v237_v5 = vmul.f32 %v221_v51, %v197_v61  ;;  %v262_v33 = vadd.f32 %v234_v21, %v230_v26 }
  0xa1   :  { %v245_v18 = vadd.f32 %v244_v8, %v236_v1  ;;  %v271_v37 = vadd.f32 %v235_v24, %v231_v29 }
  0xa2   :  { %v254_v22 = vadd.f32 %v253_v13, %v237_v5 }
  0xa3   :  { %v164_v2 = vpop.f32.mrf.mxu2 }
  0xa4   :  { %v183_v6 = vpop.f32.mrf.mxu3  ;;  %v128_v7 = vpop.f32.mrf.mxu0  ;;  %v198_v14 = vmax.f32 %v164_v2, 0.0 }
  0xa5   :  { %v200_v10 = vmax.f32 %v128_v7, 0.0  ;;  %v147_v11 = vpop.f32.mrf.mxu1  ;;  %v199_v19 = vmax.f32 %v183_v6, 0.0  ;;  %v300_v6 = vlaneseq }
  0xa6   :  { %v201_v16 = vmax.f32 %v147_v11, 0.0  ;;  %v238_v27 = vmul.f32 %v221_v51, %v198_v14 }
  0xa7   :  { %v240_v20 = vmul.f32 %v226_v15, %v200_v10  ;;  %v239_v30 = vmul.f32 %v221_v51, %v199_v19  ;;  %vm302_vm4 = vcmp.lt.s32.totalorder %v300_v6, 512 }
  0xa8   :  { %v241_v23 = vmul.f32 %v226_v15, %v201_v16  ;;  %v263_v40 = vadd.f32 %v262_v33, %v238_v27 }
  0xa9   :  { %v246_v25 = vadd.f32 %v245_v18, %v240_v20  ;;  %v272_v43 = vadd.f32 %v271_v37, %v239_v30 }
  0xaa   :  { %v255_v28 = vadd.f32 %v254_v22, %v241_v23 }
  0xab   :  { %v247_v31 = vrot.slane %v246_v25, 4  ;;  %v166_v32 = vpop.f32.mrf.mxu2 }
  0xac   :  { %v256_v34 = vrot.slane %v255_v28, 4  ;;  %v202_v35 = vmax.f32 %v166_v32, 0.0  ;;  %v185_v36 = vpop.f32.mrf.mxu3 }
  0xad   :  { %v248_v38 = vadd.f32 %v247_v31, %v246_v25  ;;  %v203_v39 = vmax.f32 %v185_v36, 0.0 }
  0xae   :  { %v257_v41 = vadd.f32 %v256_v34, %v255_v28  ;;  %v242_v42 = vmul.f32 %v226_v15, %v202_v35 }
  0xaf   :  { %v243_v44 = vmul.f32 %v226_v15, %v203_v39  ;;  %v249_v48 = vrot.slane %v248_v38, 2 }
  0xb0   :  { %v258_v46 = vrot.slane %v257_v41, 2  ;;  %v264_v47 = vadd.f32 %v263_v40, %v242_v42 }
  0xb1   :  { %v273_v49 = vadd.f32 %v272_v43, %v243_v44  ;;  %v250_v54 = vadd.f32 %v249_v48, %v248_v38 }
  0xb2   :  { %v259_v45 = vadd.f32 %v258_v46, %v257_v41  ;;  %v265_v50 = vrot.slane %v264_v47, 4 }
  0xb3   :  { %v274_v51 = vrot.slane %v273_v49, 4  ;;  %v251_v61 = vrot.slane %v250_v54, 1 }
  0xb4   :  { %v260_v52 = vrot.slane %v259_v45, 1  ;;  %v266_v53 = vadd.f32 %v265_v50, %v264_v47 }
  0xb5   :  { %v275_v55 = vadd.f32 %v274_v51, %v273_v49  ;;  %v252_v3 = vadd.f32 %v251_v61, %v250_v54 }
  0xb6   :  { %v267_v56 = vrot.slane %v266_v53, 2  ;;  %v261_v57 = vadd.f32 %v260_v52, %v259_v45 }
  0xb7   :  { %v276_v58 = vrot.slane %v275_v55, 2  ;;  %v282_v10 = vadd.f32 %v281_v59, %v252_v3 }
  0xb8   :  { %v268_v60 = vadd.f32 %v267_v56, %v266_v53  ;;  %v283_v0 = vadd.f32 %v281_v59, %v261_v57 }
  0xb9   :  { %v277_v62 = vadd.f32 %v276_v58, %v275_v55 }
  0xba   :  { %v269_v63 = vrot.slane %v268_v60, 1  ;;  %v290_v7 = vrot.slane %v283_v0, 7 }
  0xbb   :  { %v278_v1 = vrot.slane %v277_v62, 1 }
  0xbc   :  { %v270_v2 = vadd.f32 %v269_v63, %v268_v60  ;;  %v294_v12 = vsel %vm293_vm1, %v282_v10, %v290_v7 }
  0xbd   :  { %v279_v4 = vadd.f32 %v278_v1, %v277_v62 }
  0xbe   :  { %v284_v5 = vadd.f32 %v281_v59, %v270_v2 }
  0xbf   :  { %v285_v8 = vadd.f32 %v281_v59, %v279_v4 }
  0xc0   :  { %v291_v9 = vrot.slane %v284_v5, 6 }
  0xc1   :  { %v292_v11 = vrot.slane %v285_v8, 5 }
  0xc3   :  { %v296_v13 = vsel %vm295_vm2, %v291_v9, %v292_v11 }
  0xc4   :  { %v298_v14 = vsel %vm297_vm3, %v294_v12, %v296_v13 }
  0xc5   :  { %304 = vst.msk [vmem:[%s524_s4] sm:$0xf] %vm302_vm4, %v298_v14 }

</bundles_post_ra>
